<compile_context>
chip_gen: v7x
topology: tpu7x:2x2x1
jax: 0.10.0
libtpu: 0.0.40
codegen_flags: <defaults>
</compile_context>

<pallas_src>
import jax
import jax.numpy as jnp
from jax.experimental import pallas as pl
from jax.experimental.pallas import tpu as pltpu


def mlm_label_head_kernel(emb_ref, pool_ref, w1_ref, b1_ref, w2_ref, out_ref):
    # emb_ref:  [Np, H]   gathered masked-token embeddings (bf16)
    # pool_ref: [Bp, Np]  block-diagonal pooling matrix, P[b, r] = mask[r]/S (f32)
    # w1_ref:   [H, H]    synthetic encoder weight (bf16)
    # b1_ref:   [1, H]    encoder bias (f32)
    # w2_ref:   [H, Lp]   LM-head weight sliced to the label columns (f32)
    # out_ref:  [Bp, Lp]  masked mean-over-seq label logits (f32)

    # Encoder on the masked rows only (MXU, bf16 operands, f32 accumulation).
    h = jnp.tanh(
        jnp.dot(emb_ref[...], w1_ref[...], preferred_element_type=jnp.float32)
        + b1_ref[...]
    )
    # Masked mean over the sequence as a tiny matmul (f32 for exactness).
    pooled = jnp.dot(pool_ref[...], h, preferred_element_type=jnp.float32)
    # Label-sliced LM head, kept in f32 (tiny: H x Lp).
    out_ref[...] = jnp.dot(pooled, w2_ref[...], preferred_element_type=jnp.float32)


def masked_mean_label_logits(emb, mlm_mask, w1, b1, w2_labels, *,
                             max_masked_tokens=None):
    """Fused encoder -> masked mean pool -> label-sliced LM head.

    emb:        [B, S, H] bf16 (already attention-masked) embedded tokens
    mlm_mask:   [B, S]   f32, 1.0 where input_ids == mask_token_id
    w2_labels:  [H, L]   LM-head weight already sliced to the label token ids
    Returns [B, L] f32 logits (== mean over seq of masked logits at label cols).
    """
    B, S, H = emb.shape
    L = w2_labels.shape[1]
    BS = B * S
    Bp = max(8, ((B + 7) // 8) * 8)          # sublane-pad the batch
    Lp = max(128, ((L + 127) // 128) * 128)  # lane-pad the label columns

    # ---- masked-row gather (wrapper-side; exact while #masked <= cap) -------
    mask_flat = mlm_mask.reshape(BS)
    if max_masked_tokens is None:
        n_keep = BS
    else:
        n_keep = min(BS, max(8, ((max_masked_tokens + 7) // 8) * 8))
    if n_keep < BS:
        keep = jnp.argsort(-mask_flat)[:n_keep]   # masked rows first
    else:
        keep = jnp.arange(BS)
    Np = ((n_keep + 7) // 8) * 8

    emb_rows = emb.reshape(BS, H)[keep]           # [n_keep, H]
    mask_rows = mask_flat[keep]                   # [n_keep]
    batch_rows = keep // S                        # [n_keep] owning batch row
    if Np > n_keep:
        pad = Np - n_keep
        emb_rows = jnp.pad(emb_rows, ((0, pad), (0, 0)))
        mask_rows = jnp.pad(mask_rows, (0, pad))
        batch_rows = jnp.pad(batch_rows, (0, pad), constant_values=-1)

    # Pooling matrix: P[b, r] = (batch_rows[r] == b) * mask[r] / S   (f32)
    pool = ((jnp.arange(Bp)[:, None] == batch_rows[None, :]).astype(jnp.float32)
            * (mask_rows / S)[None, :])                    # [Bp, Np]

    # ---- operands -----------------------------------------------------------
    emb_c = emb_rows.astype(jnp.bfloat16)
    w1_c = w1.astype(jnp.bfloat16)
    b1_c = b1.astype(jnp.float32).reshape(1, H)
    w2_c = jnp.pad(w2_labels.astype(jnp.float32), ((0, 0), (0, Lp - L)))

    cost = pl.CostEstimate(
        flops=2 * (Np * H * H + Bp * Np * H + Bp * H * Lp),
        transcendentals=Np * H,
        bytes_accessed=(emb_c.size * 2 + pool.size * 4 + w1_c.size * 2
                        + b1_c.size * 4 + w2_c.size * 4 + Bp * Lp * 4),
    )

    out_padded = pl.pallas_call(
        mlm_label_head_kernel,
        out_shape=jax.ShapeDtypeStruct((Bp, Lp), jnp.float32),
        grid_spec=pltpu.PrefetchScalarGridSpec(
            num_scalar_prefetch=0,
            grid=(1,),   # label slicing collapsed the vocab axis to one tile
            in_specs=[
                pl.BlockSpec((Np, H), lambda i: (0, 0)),   # masked-row embeddings
                pl.BlockSpec((Bp, Np), lambda i: (0, 0)),  # pooling matrix
                pl.BlockSpec((H, H), lambda i: (0, 0)),    # encoder weight
                pl.BlockSpec((1, H), lambda i: (0, 0)),    # encoder bias
                pl.BlockSpec((H, Lp), lambda i: (0, 0)),   # label-sliced head
            ],
            out_specs=pl.BlockSpec((Bp, Lp), lambda i: (0, 0)),
        ),
        compiler_params=pltpu.CompilerParams(
            dimension_semantics=("arbitrary",),
            vmem_limit_bytes=32 * 1024 * 1024),   # >= scoped default on all gens
        cost_estimate=cost,
    )(emb_c, pool, w1_c, b1_c, w2_c)

    return out_padded[:B, :L]


def model_pt_forward(input_ids, attention_mask, label_id, *,
                     embed_table, w1, b1, w2, mask_token_id, label_name,
                     max_masked_tokens=None):
    """Mirror of Model_pt.forward. Returns (loss, pred) if label_id given else pred."""
    # TODO(synk): full pretrained transformer encoder (multi-head self-attention
    # stack) is replaced here by a synthetic 1-layer tanh encoder.
    emb = jnp.take(embed_table.astype(jnp.bfloat16), input_ids, axis=0)  # [B,S,H] bf16
    emb = emb * attention_mask[..., None].astype(emb.dtype)

    mlm_mask = (input_ids == mask_token_id).astype(jnp.float32)

    # logits[:, label_name] is the only thing read downstream -> slice the head.
    w2_labels = w2[:, label_name]                                        # [H, L]

    # Fused Pallas hot path: encoder -> masked mean pool -> label head.
    logits = masked_mean_label_logits(emb, mlm_mask, w1, b1, w2_labels,
                                      max_masked_tokens=max_masked_tokens)  # [B, L]
    pred = jnp.argmax(logits, axis=-1)

    if label_id is None:
        return pred
    # nn.CrossEntropyLoss (mean reduction)
    logp = jax.nn.log_softmax(logits, axis=-1)
    loss = -jnp.mean(jnp.take_along_axis(logp, label_id[:, None], axis=-1))
    return loss, pred


def _reference_label_logits(input_ids, attention_mask, embed_table, w1, b1, w2,
                            mask_token_id, label_name):
    """Pure-JAX reference of the same synthetic forward (unsliced, unpooled path)."""
    emb = jnp.take(embed_table.astype(jnp.bfloat16), input_ids, axis=0).astype(jnp.float32)
    emb = emb * attention_mask[..., None].astype(jnp.float32)
    emb = emb.astype(jnp.bfloat16).astype(jnp.float32)
    w1c = w1.astype(jnp.bfloat16).astype(jnp.float32)
    h = jnp.tanh(emb @ w1c + b1.reshape(1, 1, -1))
    logits = h @ w2                                                       # [B,S,V]
    logits = logits * (input_ids == mask_token_id)[..., None].astype(jnp.float32)
    logits = jnp.mean(logits, axis=1)                                     # [B,V]
    return logits[:, label_name]


if __name__ == "__main__":
    B, S, H, V = 2, 8, 32, 256          # small synthetic sizes
    mask_token_id = 5
    label_name = jnp.array([3, 17, 42, 99], dtype=jnp.int32)  # 4 label tokens

    # Deterministic synthetic parameters (module __init__ would load a checkpoint).
    kp = jax.random.PRNGKey(42)
    k1, k2, k3 = jax.random.split(kp, 3)
    embed_table = jax.random.normal(k1, (V, H), jnp.float32) * 0.02
    w1 = jax.random.normal(k2, (H, H), jnp.float32) * 0.1
    b1 = jnp.zeros((1, H), jnp.float32)
    w2 = jax.random.normal(k3, (H, V), jnp.float32) * 0.1

    # Deterministic example inputs (token ids kept > mask_token_id so the only
    # [MASK] positions are the ones we insert -> masked-row cap of 8 is exact).
    ki = jax.random.PRNGKey(0)
    ka, kb = jax.random.split(ki, 2)
    input_ids = jax.random.randint(ka, (B, S), mask_token_id + 1, V, dtype=jnp.int32)
    input_ids = input_ids.at[:, 2].set(mask_token_id)   # ensure [MASK] positions
    attention_mask = jnp.ones((B, S), dtype=jnp.int32)
    label_id = jax.random.randint(kb, (B,), 0, label_name.shape[0], dtype=jnp.int32)

    loss, pred = model_pt_forward(
        input_ids, attention_mask, label_id,
        embed_table=embed_table, w1=w1, b1=b1, w2=w2,
        mask_token_id=mask_token_id, label_name=label_name,
        max_masked_tokens=8)
    jax.block_until_ready((loss, pred))

    # Sanity check against the pure-JAX reference of the synthetic forward.
    kernel_logits = masked_mean_label_logits(
        jnp.take(embed_table.astype(jnp.bfloat16), input_ids, axis=0)
        * attention_mask[..., None].astype(jnp.bfloat16),
        (input_ids == mask_token_id).astype(jnp.float32),
        w1, b1, w2[:, label_name], max_masked_tokens=8)
    ref_logits = _reference_label_logits(
        input_ids, attention_mask, embed_table, w1, b1, w2,
        mask_token_id, label_name)
    assert jnp.allclose(kernel_logits, ref_logits, rtol=5e-2, atol=1e-4), \
        (kernel_logits, ref_logits)
    assert bool(jnp.isfinite(loss))

    print("KERNEL_OK")
</pallas_src>

<mosaic_0001>
module attributes {stable_mosaic.version = 11 : i64} {
  func.func @mlm_label_head_kernel(%arg0: i32, %arg1: memref<8x32xbf16, #tpu.memory_space<vmem>>, %arg2: memref<8x8xf32, #tpu.memory_space<vmem>>, %arg3: memref<32x32xbf16, #tpu.memory_space<vmem>>, %arg4: memref<1x32xf32, #tpu.memory_space<vmem>>, %arg5: memref<32x128xf32, #tpu.memory_space<vmem>>, %arg6: memref<8x128xf32, #tpu.memory_space<vmem>>) attributes {dimension_semantics = [#tpu.dimension_semantics<arbitrary>], iteration_bounds = array<i64: 1>, scalar_prefetch = 0 : i64, scratch_operands = 0 : i64, tpu.core_type = #tpu.core_type<tc>, window_params = [{pipeline_mode = #tpu.pipeline_mode<synchronous>, transform_indices = @transform_0, window_bounds = array<i64: 8, 32>}, {pipeline_mode = #tpu.pipeline_mode<synchronous>, transform_indices = @transform_1, window_bounds = array<i64: 8, 8>}, {pipeline_mode = #tpu.pipeline_mode<synchronous>, transform_indices = @transform_2, window_bounds = array<i64: 32, 32>}, {pipeline_mode = #tpu.pipeline_mode<synchronous>, transform_indices = @transform_3, window_bounds = array<i64: 1, 32>}, {pipeline_mode = #tpu.pipeline_mode<synchronous>, transform_indices = @transform_4, window_bounds = array<i64: 32, 128>}, {pipeline_mode = #tpu.pipeline_mode<synchronous>, transform_indices = @transform_5, window_bounds = array<i64: 8, 128>}]} {
    %c0 = arith.constant 0 : index
    %c0_0 = arith.constant 0 : index
    %0 = vector.load %arg1[%c0, %c0_0] : memref<8x32xbf16, #tpu.memory_space<vmem>>, vector<8x32xbf16>
    %c0_1 = arith.constant 0 : index
    %c0_2 = arith.constant 0 : index
    %1 = vector.load %arg3[%c0_1, %c0_2] : memref<32x32xbf16, #tpu.memory_space<vmem>>, vector<32x32xbf16>
    %cst = arith.constant dense<0.000000e+00> : vector<8x32xf32>
    %2 = tpu.matmul %0, %1, %cst {dimension_numbers = #tpu.dot_dimension_numbers<[1], [0], [0], [1], [0, 0, 1, 1], [], []>} : vector<8x32xbf16>, vector<32x32xbf16>, vector<8x32xf32> -> vector<8x32xf32>
    %c0_3 = arith.constant 0 : index
    %c0_4 = arith.constant 0 : index
    %3 = vector.load %arg4[%c0_3, %c0_4] : memref<1x32xf32, #tpu.memory_space<vmem>>, vector<1x32xf32>
    %4 = vector.broadcast %3 : vector<1x32xf32> to vector<8x32xf32>
    %5 = arith.addf %2, %4 : vector<8x32xf32>
    %6 = math.tanh %5 : vector<8x32xf32>
    %c0_5 = arith.constant 0 : index
    %c0_6 = arith.constant 0 : index
    %7 = vector.load %arg2[%c0_5, %c0_6] : memref<8x8xf32, #tpu.memory_space<vmem>>, vector<8x8xf32>
    %cst_7 = arith.constant dense<0.000000e+00> : vector<8x32xf32>
    %8 = tpu.matmul %7, %6, %cst_7 {dimension_numbers = #tpu.dot_dimension_numbers<[1], [0], [0], [1], [0, 0, 1, 1], [], []>} : vector<8x8xf32>, vector<8x32xf32>, vector<8x32xf32> -> vector<8x32xf32>
    %c0_8 = arith.constant 0 : index
    %c0_9 = arith.constant 0 : index
    %9 = vector.load %arg5[%c0_8, %c0_9] : memref<32x128xf32, #tpu.memory_space<vmem>>, vector<32x128xf32>
    %cst_10 = arith.constant dense<0.000000e+00> : vector<8x128xf32>
    %10 = tpu.matmul %8, %9, %cst_10 {dimension_numbers = #tpu.dot_dimension_numbers<[1], [0], [0], [1], [0, 0, 1, 1], [], []>} : vector<8x32xf32>, vector<32x128xf32>, vector<8x128xf32> -> vector<8x128xf32>
    %c0_11 = arith.constant 0 : index
    %c0_12 = arith.constant 0 : index
    %11 = vector.load %arg6[%c0_11, %c0_12] : memref<8x128xf32, #tpu.memory_space<vmem>>, vector<8x128xf32>
    tpu.vector_store %arg6[%c0_11, %c0_12], %10 {strides = array<i32>} : memref<8x128xf32, #tpu.memory_space<vmem>>, vector<8x128xf32>,
    return
  }
  func.func @transform_0(%arg0: i32) -> (i32, i32) {
    %c0_i32 = arith.constant 0 : i32
    %c0_i32_0 = arith.constant 0 : i32
    %c0_i32_1 = arith.constant 0 : i32
    return %c0_i32, %c0_i32_0 : i32, i32
  }
  func.func @transform_1(%arg0: i32) -> (i32, i32) {
    %c0_i32 = arith.constant 0 : i32
    %c0_i32_0 = arith.constant 0 : i32
    %c0_i32_1 = arith.constant 0 : i32
    return %c0_i32, %c0_i32_0 : i32, i32
  }
  func.func @transform_2(%arg0: i32) -> (i32, i32) {
    %c0_i32 = arith.constant 0 : i32
    %c0_i32_0 = arith.constant 0 : i32
    %c0_i32_1 = arith.constant 0 : i32
    return %c0_i32, %c0_i32_0 : i32, i32
  }
  func.func @transform_3(%arg0: i32) -> (i32, i32) {
    %c0_i32 = arith.constant 0 : i32
    %c0_i32_0 = arith.constant 0 : i32
    %c0_i32_1 = arith.constant 0 : i32
    return %c0_i32, %c0_i32_0 : i32, i32
  }
  func.func @transform_4(%arg0: i32) -> (i32, i32) {
    %c0_i32 = arith.constant 0 : i32
    %c0_i32_0 = arith.constant 0 : i32
    %c0_i32_1 = arith.constant 0 : i32
    return %c0_i32, %c0_i32_0 : i32, i32
  }
  func.func @transform_5(%arg0: i32) -> (i32, i32) {
    %c0_i32 = arith.constant 0 : i32
    %c0_i32_0 = arith.constant 0 : i32
    %c0_i32_1 = arith.constant 0 : i32
    return %c0_i32, %c0_i32_0 : i32, i32
  }
}

</mosaic_0001>

<bundles_post_ra>
// kernel: tpu_custom_call.1
= control target key start
LH: loop header
LB: loop body
LE: loop exit
PB: predicated region body
PF: predicated region fallthrough
CT: control target
= control target key end

     0   :  { %10 = vsyncpa [#allocation3], 0  ;;  %s602_s0 = inlined_call_operand.hbm [shape: bf16[8,32], index: 0, kind: input, shape index: {}]   ;;  %s603_s1 = inlined_call_operand.hbm [shape: f32[8,8], index: 1, kind: input, shape index: {}]   ;;  %s604_s2 = inlined_call_operand.hbm [shape: bf16[32,32], index: 2, kind: input, shape index: {}]   ;;  %s605_s3 = inlined_call_operand.vmem [shape: f32[1,32], index: 3, kind: input, shape index: {}]   ;;  %s606_s4 = inlined_call_operand.hbm [shape: f32[32,128], index: 4, kind: input, shape index: {}]   ;;  %s607_s5 = inlined_call_operand.hbm [shape: f32[8,128], index: 5, kind: output, shape index: {}]  }
   0x1   :  { %11 = vsyncpa [#allocation6], 0 }
   0x2   :  { %12 = vsyncpa [#allocation9], 0 }
   0x3   :  { %13 = vsyncpa [#allocation4], 0  ;;  %s492_s18 = smov [#allocation5]   ;;  %s493_s20 = smov [#allocation2]  }
   0x4   :  { %s30_s19 = sshll.u32 %s492_s18, 4  ;;  %s20_s21 = sshll.u32 %s493_s20, 4  ;;  %s31_s19 = int_to_ptr.vmem [resolvable:$true] %s30_s19  ;;  %s21_s21 = int_to_ptr.vmem [resolvable:$true] %s20_s21 }
   0x5   :  { %s374_s24 = scalar_lea.hbm %s603_s1, 128 }
   0x6   :  { %p375_p0 = scmp.ne.s32.totalorder %s603_s1, %s374_s24  ;;  %p378_p1 = scmp.lt.u32.totalorder %s374_s24, %s603_s1 }
   0x8   :  { %p380_p2 = pnand %p378_p1, %p375_p0 }
   0xa   :  { %383 = shalt.err (!%p380_p2)
}
   0xb   :  { %s384_s29 = scalar_lea.vmem %s31_s19, 128  ;;  %p389_p4 = scmp.lt.s32.totalorder %s31_s19, %s31_s19 }
   0xc   :  { %p385_p3 = scmp.ne.s32.totalorder %s31_s19, %s384_s29  ;;  %p390_p5 = scmp.lt.s32.totalorder %s384_s29, %s384_s29 }
   0xe   :  { %p391_p6 = por %p390_p5, %p389_p4 }
  0x10   :  { %p392_p7 = pnand %p391_p6, %p385_p3 }
  0x12   :  { %395 = shalt.err (!%p392_p7)
}
  0x13   :  { %33 = dma.hbm_to_vmem [thread:$0]  %s603_s1, 128, %s31_s19, [#allocation6]  }
  0x14   :  { %s396_s9 = scalar_lea.hbm %s602_s0, 64 }
  0x15   :  { %p397_p8 = scmp.ne.s32.totalorder %s602_s0, %s396_s9  ;;  %p400_p9 = scmp.lt.u32.totalorder %s396_s9, %s602_s0 }
  0x17   :  { %p402_p10 = pnand %p400_p9, %p397_p8 }
  0x19   :  { %405 = shalt.err (!%p402_p10)
}
  0x1a   :  { %s406_s14 = scalar_lea.vmem %s21_s21, 64  ;;  %p411_p12 = scmp.lt.s32.totalorder %s21_s21, %s21_s21 }
  0x1b   :  { %p407_p11 = scmp.ne.s32.totalorder %s21_s21, %s406_s14  ;;  %p412_p13 = scmp.lt.s32.totalorder %s406_s14, %s406_s14 }
  0x1d   :  { %p413_p0 = por %p412_p13, %p411_p12 }
  0x1f   :  { %p414_p1 = pnand %p413_p0, %p407_p11 }
  0x21   :  { %417 = shalt.err (!%p414_p1)
}
  0x22   :  { %23 = dma.hbm_to_vmem [thread:$0]  %s602_s0, 64, %s21_s21, [#allocation3]  }
  0x23   :  { %s494_s16 = smov [#allocation7]   ;;  %s418_s20 = scalar_lea.hbm %s604_s2, 256 }
  0x24   :  { %s39_s17 = sshll.u32 %s494_s16, 4  ;;  %p419_p2 = scmp.ne.s32.totalorder %s604_s2, %s418_s20  ;;  %s40_s17 = int_to_ptr.vmem [resolvable:$true] %s39_s17 }
  0x25   :  { %p422_p3 = scmp.lt.u32.totalorder %s418_s20, %s604_s2 }
  0x27   :  { %p424_p4 = pnand %p422_p3, %p419_p2 }
  0x29   :  { %427 = shalt.err (!%p424_p4)
}
  0x2a   :  { %s428_s26 = scalar_lea.vmem %s40_s17, 256  ;;  %p433_p6 = scmp.lt.s32.totalorder %s40_s17, %s40_s17 }
  0x2b   :  { %p429_p5 = scmp.ne.s32.totalorder %s40_s17, %s428_s26  ;;  %p434_p7 = scmp.lt.s32.totalorder %s428_s26, %s428_s26 }
  0x2d   :  { %p435_p8 = por %p434_p7, %p433_p6 }
  0x2f   :  { %p436_p9 = pnand %p435_p8, %p429_p5 }
  0x31   :  { %439 = shalt.err (!%p436_p9)
}
  0x32   :  { %s495_s0 = smov 64   ;;  %s496_s21 = smov 4  }
  0x33   :  { %45 = dma.hbm_to_vmem [thread:$0]  %s604_s2, 256, %s40_s17, [#allocation6], %s495_s0, %s495_s0, %s496_s21  }
  0x34   :  { %s497_s29 = smov [#allocation8]   ;;  %s440_s8 = scalar_lea.hbm %s606_s4, 512 }
  0x35   :  { %s53_s30 = sshll.u32 %s497_s29, 4  ;;  %p441_p10 = scmp.ne.s32.totalorder %s606_s4, %s440_s8  ;;  %s54_s30 = int_to_ptr.vmem [resolvable:$true] %s53_s30 }
  0x36   :  { %p444_p11 = scmp.lt.u32.totalorder %s440_s8, %s606_s4 }
  0x38   :  { %p446_p12 = pnand %p444_p11, %p441_p10 }
  0x3a   :  { %449 = shalt.err (!%p446_p12)
}
  0x3b   :  { %s450_s13 = scalar_lea.vmem %s54_s30, 512  ;;  %p455_p0 = scmp.lt.s32.totalorder %s54_s30, %s54_s30 }
  0x3c   :  { %p451_p13 = scmp.ne.s32.totalorder %s54_s30, %s450_s13  ;;  %p456_p1 = scmp.lt.s32.totalorder %s450_s13, %s450_s13 }
  0x3e   :  { %p457_p2 = por %p456_p1, %p455_p0 }
  0x40   :  { %p458_p3 = pnand %p457_p2, %p451_p13 }
  0x42   :  { %461 = shalt.err (!%p458_p3)
}
  0x43   :  { %s498_s2 = smov 128   ;;  %s499_s14 = smov 8  }
  0x44   :  { %59 = dma.hbm_to_vmem [thread:$0]  %s606_s4, 512, %s54_s30, [#allocation9], %s498_s2, %s498_s2, %s499_s14  }
  0x45   :  { %484 = dma.done.wait [#allocation3], 64  }
  0x46   :  { %485 = vsyncadd [#allocation3], 4294967232 }
  0x47   :  { %486 = dma.done.wait [#allocation6], 384  }
  0x48   :  { %487 = vsyncadd [#allocation6], 4294966912 }
  0x49   :  { %488 = dma.done.wait [#allocation9], 512  }
  0x4a   :  { %489 = vsyncadd [#allocation9], 4294966784  ;;  %v500_v0 = vmov 0.0   ;;  %vm501_vm0 = vmmov 0   ;;  %v370_v1 = vld [vmem:[#allocation7] sm:$0xff]   ;;  %v371_v2 = vld [vmem:[#allocation7 + $0x8] sm:$0xff]  }
  0x4b   :  { %328 = vmatprep.subr.bf16.mxu0 %v500_v0  ;;  %332 = vmatprep.mubr.msk.bf16.mxu0 %vm501_vm0, %v500_v0  ;;  %v73_v3 = vld [vmem:[#allocation2] sm:$0xf]  ;;  %vm97_vm1 = vcmask 261120   ;;  %v218_v11 = vld [vmem:[#allocation8 + $0x8] sm:$0xff]  ;;  %vm143_vm2 = vcmask 64512   ;;  %v219_v15 = vld [vmem:[#allocation8 + $0x10] sm:$0xff] }
  0x4c   :  { %336 = vmatprep.subr.mxu1 %v500_v0  ;;  %338 = vmatprep.mubr.msk.f32.mxu1 %vm501_vm0, %v500_v0  ;;  %v312_v4 = vld [vmem:[%s605_s3] ss:$0 sm:$0xff]  ;;  %v142_v12 = vld [vmem:[#allocation5] sm:$0xff]  ;;  %v220_v16 = vld [vmem:[#allocation8 + $0x18] sm:$0xff]  ;;  %v502_v17 = vmov 0.0|0.0   ;;  %s503_s3 = smov [#allocation10]  }
  0x4d   :  { %329 = vmatpush3.bf16.msra.mxu0 %v370_v1  ;;  %v217_v10 = vld [vmem:[#allocation8] sm:$0xff]  ;;  %v356_v18 = vpack.c.bf16 %v220_v16, %v219_v15  ;;  %s301_s17 = sshll.u32 %s503_s3, 4  ;;  %s302_s17 = int_to_ptr.vmem [resolvable:$true] %s301_s17 }
  0x4e   :  { %330 = vmatprep.subr.bf16.mxu0 %v500_v0  ;;  %v353_v13 = vpack.c.bf16 %v218_v11, %v217_v10  ;;  %s462_s18 = scalar_lea.vmem %s302_s17, 128  ;;  %p467_p5 = scmp.lt.s32.totalorder %s302_s17, %s302_s17 }
  0x4f   :  { %p463_p4 = scmp.ne.s32.totalorder %s302_s17, %s462_s18  ;;  %p468_p6 = scmp.lt.s32.totalorder %s462_s18, %s462_s18 }
  0x51   :  { %331 = vmatpush3.bf16.msra.mxu0 %v371_v2  ;;  %p469_p7 = por %p468_p6, %p467_p5 }
  0x53   :  { %p470_p8 = pnand %p469_p7, %p463_p4 }
  0x54   :  { %333 = vmatmul.mubr.msk.bf16.vlgmr.msra.gmra.mrb[0].mxu0 %vm97_vm1, %v73_v3 }
 0x127   :  { %v135_v5 = vpop.f32.mrb[0].mxu0 }
 0x128   :  { %v136_v6 = vadd.f32 %v312_v4, %v135_v5  ;;  %v334_v7 = vpop.f32.mrb[1].mxu0 }
 0x129   :  { %v138_v8 = vpop.f32.mrb[2].mxu0 }
 0x12a   :  { %372 = vtanh.f32 %v136_v6  ;;  %v335_v9 = vpop.f32.mrb[3].mxu0 }
 0x134   :  { %v373_v14 = vpop.eup %372 }
 0x135   :  { %337 = vmatpush3.msra.mxu1 %v373_v14 }
 0x136   :  { %339 = vmatmul.mubr.msk.f32.vlgmr.msra.gmra.mrb[0].mxu1 %vm143_vm2, %v142_v12  ;;  %352 = vmatprep.subr.bf16.mxu1 %v502_v17 }
 0x137   :  { %354 = vmatpush3.bf16.msra.mxu1 %v353_v13  ;;  %349 = vmatprep.mubr.msk.f32.mxu1 %vm501_vm0, %v500_v0 }
 0x138   :  { %355 = vmatprep.subr.bf16.mxu1 %v502_v17 }
 0x13b   :  { %357 = vmatpush3.bf16.msra.mxu1 %v356_v18 }
 0x209   :  { %v213_v19 = vpop.f32.mrb[0].mxu1 }
 0x20a   :  { %v340_v20 = vpop.f32.mrb[1].mxu1  ;;  %350 = vmatmul.mubr.msk.f32.vlgmr.msra.gmra.mrb[2].mxu1 %vm97_vm1, %v213_v19 }
 0x2dd   :  { %v290_v21 = vpop.f32.mrb[2].mxu1 }
 0x2de   :  { %294 = vst [vmem:[#allocation10] sm:$0xff] %v290_v21  ;;  %v351_v22 = vpop.f32.mrb[3].mxu1 }
 0x2df   :  { %473 = shalt.err (!%p470_p8)
}
 0x2e0   :  { %s474_s22 = scalar_lea.hbm %s607_s5, 128 }
 0x2e1   :  { %p475_p9 = scmp.ne.s32.totalorder %s607_s5, %s474_s22  ;;  %p478_p10 = scmp.lt.u32.totalorder %s474_s22, %s607_s5 }
 0x2e3   :  { %p480_p11 = pnand %p478_p10, %p475_p9 }
 0x2e5   :  { %483 = shalt.err (!%p480_p11)
}
 0x2e6   :  { %304 = dma.vmem_to_hbm [thread:$0]  %s302_s17, 128, %s607_s5, [#allocation4]  }
 0x2e7   :  { %490 = dma.done.wait [#allocation4], 128  }
 0x2e8   :  { %491 = vsyncadd [#allocation4], 4294967168 }
 0x2e9   :  { %308 = vsyncpa [#allocation3], 1 }
 0x2ea   :  { %309 = vsyncpa [#allocation6], 1 }
 0x2eb   :  { %310 = vsyncpa [#allocation9], 1 }
 0x2ec   :  { %311 = vsyncpa [#allocation4], 1 }

</bundles_post_ra>
